<compile_context>
chip_gen: v6e
topology: v6e:2x2x1
jax: 0.10.0
libtpu: 0.0.40
codegen_flags: <defaults>
</compile_context>

<pallas_src>
import jax
import jax.numpy as jnp
from jax.experimental import pallas as pl
from jax.experimental.pallas import tpu as pltpu

_LANES = 1024                  # lane-dense last dim (multiple of 128)
_TARGET_TILE_BYTES = 4 << 20   # ~4 MiB per tile buffer / per DMA
_MIN_KERNEL_ROWS = 8           # below this, plain jnp beats kernel launch cost
_VMEM_LIMIT_BYTES = 40 << 20   # 2x(in+out) double-buffered 4 MiB tiles + headroom
                               # (safe on v5e/v6e/v7x; overrides v5e's 16 MiB default)


def _adaptive_sigmoid_kernel(alpha_ref, x_ref, o_ref):
    """y = 1 / (1 + exp(-alpha * x)) on one (tile_rows, 1024) tile."""
    x = x_ref[...].astype(jnp.float32)      # upcast in-register (VPU has slack)
    a = alpha_ref[0]                        # runtime scalar from SMEM
    y = 1.0 / (1.0 + jnp.exp(-a * x))       # exp -> EUP; exact divide (mem-bound)
    o_ref[...] = y.astype(o_ref.dtype)      # store directly in input dtype


def _sigmoid_jnp(x, alpha):
    """Fused plain-JAX path for tails / tiny inputs (same numerics as kernel)."""
    xf = x.astype(jnp.float32)
    return (1.0 / (1.0 + jnp.exp(-alpha * xf))).astype(x.dtype)


def _round_up(x, m):
    return -(-x // m) * m


def _choose_tile_rows(rows, itemsize):
    # Sublane multiple respecting dtype packing: 8 (f32), 16 (bf16), 32 (8-bit).
    mult = 8 * max(1, 4 // itemsize)
    # Byte-targeted tile: ~4 MiB per buffer regardless of dtype.
    target = max(mult, (_TARGET_TILE_BYTES // (_LANES * itemsize)) // mult * mult)
    if rows <= 2 * mult:
        return rows                       # single full-dim block (always legal)
    if rows <= target:
        # Keep >= 2 grid steps so the parallel axis can split across v7x's 2 TCs.
        return _round_up(pl.cdiv(rows, 2), mult)
    return target                         # rows > target => grid >= 2 automatically


def _adaptive_sigmoid_2d(x2d, alpha_arr):
    rows, lanes = x2d.shape
    tile_rows = _choose_tile_rows(rows, x2d.dtype.itemsize)
    grid = (pl.cdiv(rows, tile_rows),)
    return pl.pallas_call(
        _adaptive_sigmoid_kernel,
        out_shape=jax.ShapeDtypeStruct((rows, lanes), x2d.dtype),
        grid_spec=pltpu.PrefetchScalarGridSpec(
            num_scalar_prefetch=1,        # alpha -> SMEM, first kernel ref
            grid=grid,
            in_specs=[pl.BlockSpec((tile_rows, lanes), lambda i, a: (i, 0))],
            out_specs=pl.BlockSpec((tile_rows, lanes), lambda i, a: (i, 0)),
        ),
        compiler_params=pltpu.CompilerParams(
            dimension_semantics=("parallel",),
            vmem_limit_bytes=_VMEM_LIMIT_BYTES,
        ),
    )(alpha_arr, x2d)


def adaptive_sigmoid(x, alpha):
    """forward(x) = 1 / (1 + exp(-alpha * x)) via a Pallas TPU kernel.

    x may be any shape / float dtype; output shape and dtype match x.
    alpha may be a Python number or a traced/learnable scalar.
    """
    # Positivity check only when alpha is a concrete Python number (matches the
    # PyTorch constructor).  Traced alphas skip it so jit/grad still work.
    if isinstance(alpha, (int, float)) and alpha <= 0:
        raise ValueError("Alpha should be positive to avoid instability.")

    orig_shape = x.shape
    n = x.size
    if n == 0:
        return x

    alpha_arr = jnp.asarray(alpha, dtype=jnp.float32).reshape((1,))

    rows = n // _LANES
    tail = n - rows * _LANES

    # Tiny inputs: launch + per-step overhead dominates and blocks XLA fusion.
    if rows < _MIN_KERNEL_ROWS:
        return _sigmoid_jnp(x, alpha_arr[0]).reshape(orig_shape)

    x_flat = jnp.ravel(x)   # metadata-only for contiguous inputs

    if tail == 0:
        # Aligned fast path: exactly 1 HBM read + 1 HBM write, no pad/slice.
        out2d = _adaptive_sigmoid_2d(x_flat.reshape(rows, _LANES), alpha_arr)
        return out2d.reshape(orig_shape)

    # Unaligned: kernel on the aligned (rows, 1024) prefix, fused jnp on the
    # <1024-element tail (no full-array pad / full-array slice round trips).
    # TODO(synk): a fully zero-copy ragged tail would need a 1-D / Element-mapped
    # BlockSpec; the concatenate below still costs one extra output write.
    main = _adaptive_sigmoid_2d(
        x_flat[: rows * _LANES].reshape(rows, _LANES), alpha_arr
    ).reshape(-1)
    tail_out = _sigmoid_jnp(x_flat[rows * _LANES:], alpha_arr[0])
    return jnp.concatenate([main, tail_out]).reshape(orig_shape)


if __name__ == "__main__":
    key = jax.random.PRNGKey(0)
    alpha = 1.5  # constructor argument, must be > 0

    k1, k2, k3 = jax.random.split(key, 3)
    # Primary small NCHW-style input consistent with the module.
    x_small = jax.random.normal(k1, (2, 4, 16, 16), dtype=jnp.float32)
    # 1024-aligned input: exercises the Pallas fast path (64 rows, 2 grid steps).
    x_aligned = jax.random.normal(k2, (2, 8, 64, 64), dtype=jnp.float32)
    # Non-aligned input: exercises the kernel + fused-tail path (8 rows + 688 tail).
    x_ragged = jax.random.normal(k3, (2, 3, 40, 37), dtype=jnp.float32)

    ok = True
    for x in (x_small, x_aligned, x_ragged):
        y = jax.block_until_ready(adaptive_sigmoid(x, alpha))
        y_ref = 1.0 / (1.0 + jnp.exp(-alpha * x))
        assert y.shape == x.shape and y.dtype == x.dtype
        err = float(jnp.max(jnp.abs(y - y_ref)))
        ok = ok and (err < 1e-5)

    if ok:
        print("KERNEL_OK")
</pallas_src>

<mosaic_0001>
module attributes {stable_mosaic.version = 11 : i64} {
  func.func @_adaptive_sigmoid_kernel(%arg0: i32, %arg1: memref<1xf32, #tpu.memory_space<smem>>, %arg2: memref<32x1024xf32, #tpu.memory_space<vmem>>, %arg3: memref<32x1024xf32, #tpu.memory_space<vmem>>) attributes {dimension_semantics = [#tpu.dimension_semantics<parallel>], iteration_bounds = array<i64: 2>, scalar_prefetch = 1 : i64, scratch_operands = 0 : i64, tpu.core_type = #tpu.core_type<tc>, window_params = [{transform_indices = @transform_0, window_bounds = array<i64: 32, 1024>}, {transform_indices = @transform_1, window_bounds = array<i64: 32, 1024>}]} {
    %c0 = arith.constant 0 : index
    %c0_0 = arith.constant 0 : index
    %0 = vector.load %arg2[%c0, %c0_0] : memref<32x1024xf32, #tpu.memory_space<vmem>>, vector<32x1024xf32>
    %c0_1 = arith.constant 0 : index
    %1 = memref.load %arg1[%c0_1] : memref<1xf32, #tpu.memory_space<smem>>
    %cst = arith.constant 0.000000e+00 : f32
    %2 = arith.subf %cst, %1 : f32
    %3 = vector.broadcast %2 : f32 to vector<32x1024xf32>
    %4 = arith.mulf %3, %0 : vector<32x1024xf32>
    %5 = math.exp %4 : vector<32x1024xf32>
    %cst_2 = arith.constant 1.000000e+00 : f32
    %6 = vector.broadcast %cst_2 : f32 to vector<32x1024xf32>
    %7 = arith.addf %6, %5 : vector<32x1024xf32>
    %cst_3 = arith.constant 1.000000e+00 : f32
    %8 = vector.broadcast %cst_3 : f32 to vector<32x1024xf32>
    %9 = arith.divf %8, %7 : vector<32x1024xf32>
    %c0_4 = arith.constant 0 : index
    %c0_5 = arith.constant 0 : index
    %10 = vector.load %arg3[%c0_4, %c0_5] : memref<32x1024xf32, #tpu.memory_space<vmem>>, vector<32x1024xf32>
    tpu.vector_store %arg3[%c0_4, %c0_5], %9 {strides = array<i32>} : memref<32x1024xf32, #tpu.memory_space<vmem>>, vector<32x1024xf32>,
    return
  }
  func.func @transform_0(%arg0: i32, %arg1: memref<1xf32, #tpu.memory_space<smem>>) -> (i32, i32) {
    %c0_i32 = arith.constant 0 : i32
    %c0_i32_0 = arith.constant 0 : i32
    return %arg0, %c0_i32 : i32, i32
  }
  func.func @transform_1(%arg0: i32, %arg1: memref<1xf32, #tpu.memory_space<smem>>) -> (i32, i32) {
    %c0_i32 = arith.constant 0 : i32
    %c0_i32_0 = arith.constant 0 : i32
    return %arg0, %c0_i32 : i32, i32
  }
}

</mosaic_0001>

<bundles_post_ra>
// kernel: tpu_custom_call.1
= control target key start
LH: loop header
LB: loop body
LE: loop exit
PB: predicated region body
PF: predicated region fallthrough
CT: control target
= control target key end

     0   :  { %s1064_s0 = inlined_call_operand.<no memory space> [shape: f32[1], index: 0, kind: input, shape index: {}]   ;;  %s1065_s1 = inlined_call_operand.hbm [shape: f32[64,1024], index: 1, kind: input, shape index: {}]   ;;  %s1066_s2 = inlined_call_operand.hbm [shape: f32[64,1024], index: 2, kind: output, shape index: {}]  }
   0x1   :  { %7 = sst [smem:[#allocation3]] %s1064_s0 }
   0x2   :  { %8 = vsyncpa [#allocation5], 0 }
   0x3   :  { %10 = vsyncpa [#allocation5 + $0x1], 0 }
   0x4   :  { %11 = vsyncpa [#allocation6], 0 }
   0x5   :  { %13 = vsyncpa [#allocation6 + $0x1], 0  ;;  %s803_s11 = smov 0   ;;  %s805_s12 = smov 0  }
   0x6   :  { %s807_s13 = smov 0   ;;  %s809_s14 = smov 0  }
   0x7 LB: > { %s824_s0 = sadd.s32 4294967295, %s777_s14   ;;  %s487_s15 = sadd.s32 4294967294, %s777_s14   ;;  %s777_s14 = sphi %s809_s14, %s1081_s14   ;;  %s773_s13 = sphi %s807_s13, %s1080_s13   ;;  %s769_s12 = sphi %s805_s12, %s1079_s12   ;;  %s765_s11 = sphi %s803_s11, %s1078_s11  }
   0x8   : > { %s828_s16 = sadd.s32 1, %s777_s14   ;;  %s26_s17 = sadd.s32 1, %s773_s13 }
   0x9   : > { %s23_s18 = ssub.s32 %s777_s14, %s828_s16  ;;  %p33_p0 = scmp.ne.s32.totalorder %s773_s13, %s769_s12 }
   0xa   : > { %p24_p1 = scmp.eq.s32.totalorder %s23_s18, 0  ;;  %p34_p2 = scmp.eq.s32.totalorder %s777_s14, 0 }
   0xb   : > { %p39_p3 = scmp.ne.s32.totalorder %s769_s12, %s765_s11  ;;  %p40_p4 = scmp.eq.s32.totalorder %s824_s0, 0 }
   0xc   : > { %s840_s19 = scalar_select %p24_p1, %s773_s13, %s26_s17  }
   0xd   : > { %p842_p5 = por %p34_p2, %p33_p0  ;;  %p846_p6 = por %p40_p4, %p39_p3 }
   0xe   : > { %p63_p7 = scmp.eq.s32.totalorder %s824_s0, 1  ;;  %p69_p8 = scmp.eq.s32.totalorder %s487_s15, 1 }
   0xf   : > { %s1070_s21 = scalar_select %p846_p6, 1, 0 }
  0x10   : > { %p519_p10 = scmp.lt.s32.totalorder %s777_s14, 2  ;;  %p853_p11 = por %p63_p7, %p33_p0 }
  0x11   : > { %p857_p12 = por %p69_p8, %p39_p3  ;;  %s89_s24 = sand.u32 1, %s773_s13  }
  0x12   : > { %s1071_s22 = scalar_select %p853_p11, 1, 0 }
  0x13   : > { %s1072_s23 = scalar_select %p857_p12, 1, 0 }
  0x14   : > { %s504_s25 = sshll.u32 %s777_s14, 12  ;;  %s490_s26 = sshll.u32 %s89_s24, 8 }
  0x15   : > { %s866_s29 = scalar_lea.hbm %s1065_s1, %s504_s25  ;;  %s93_s30 = scalar_lea.vmem [#allocation4], %s490_s26 }
  0x16   : > { %s101_s3 = sshll.u32 %s93_s30, 4  ;;  %p870_p13 = pnand %p519_p10, %p842_p5  ;;  %s874_s3 = int_to_ptr.vmem [resolvable:$true] %s101_s3 }
  0x17   : > { %s876_s5 = scalar_lea.sflag [#allocation5], %s89_s24  ;;  %s685_s6 = scalar_lea.hbm %s866_s29, 4096 }
  0x18   : > { %p686_p0 = scmp.ne.s32.totalorder %s866_s29, %s685_s6  ;;  %p687_p1 = pneg %p870_p13 }
  0x19   : > { %s690_s9 = scalar_lea.hbm %s1065_s1, 8192  ;;  %p691_p4 = scmp.lt.s32.totalorder %s866_s29, %s1065_s1 }
  0x1a   : > { %p688_p2 = pnand %p687_p1, %p686_p0  ;;  %p692_p5 = scmp.lt.s32.totalorder %s690_s9, %s685_s6 }
  0x1c   : > { %p689_p3 = pneg %p688_p2  ;;  %p693_p7 = por %p692_p5, %p691_p4 }
  0x1e   : > { %p694_p8 = pnand %p693_p7, %p689_p3 }
  0x20   : > { %697 = shalt.err (!%p694_p8)
}
  0x21   : > { %s698_s17 = scalar_lea.vmem %s874_s3, 4096  ;;  %s779_s18 = smov [#allocation4]  }
  0x22   : > { %p699_p10 = scmp.ne.s32.totalorder %s874_s3, %s698_s17  ;;  %s703_s20 = sshll.u32 %s779_s18, 4  ;;  %s704_s20 = int_to_ptr.vmem [resolvable:$false] %s703_s20 }
  0x23   : > { %s705_s24 = scalar_lea.vmem %s704_s20, 8192  ;;  %p706_p2 = scmp.lt.s32.totalorder %s874_s3, %s704_s20 }
  0x24   : > { %p701_p9 = pnand %p699_p10, %p687_p1  ;;  %p707_p12 = scmp.lt.s32.totalorder %s705_s24, %s698_s17 }
  0x26   : > { %p702_p0 = pneg %p701_p9  ;;  %p708_p11 = por %p707_p12, %p706_p2 }
  0x28   : > { %p709_p6 = pnand %p708_p11, %p702_p0 }
  0x2a   : > { %712 = shalt.err (!%p709_p6)
}
  0x2b   : > { %s780_s25 = smov 1024   ;;  %s781_s26 = smov 64  }
  0x2c   : > { %514 = dma.hbm_to_vmem [thread:$0]  (!%p870_p13), %s866_s29, 4096, %s874_s3, %s876_s5, %s780_s25, %s780_s25, %s781_s26  }
  0x2d   : > { %p494_p9 = scmp.ge.s32.totalorder %s777_s14, 1  ;;  %p109_p1 = scmp.lt.s32.totalorder %s777_s14, 3 }
  0x2f   : > { %p110_p3 = pnand %p494_p9, %p109_p1 }
  0x30   : > { %s900_s27 = sand.u32 (!%p110_p3), 1, %s769_s12   ;;  %p1074_p6 = scmp.ne.s32.totalorder (!%p110_p3), %s1070_s21, 0 }
  0x31   : > { %113 = sbr.rel (%p110_p3) target bundleno = 159 (0x9f), region = 24  ;;  %s495_s28 = sshll.u32 (!%p110_p3), %s900_s27, 8 }
  0x32   : > { %s116_s30 = scalar_lea.sflag (!%p110_p3), [#allocation5], %s900_s27  ;;  %s906_s6 = scalar_lea.vmem (!%p110_p3), [#allocation4], %s495_s28 }
  0x36   : > { %756 = dma.done.wait (%p1074_p6), %s116_s30, 4096  }
  0x37   : > { %758 = vsyncadd (%p1074_p6), %s116_s30, 4294963200  ;;  %s172_s29 = sld [smem:[#allocation3]]  ;;  %v140_v0 = vld [vmem:[%s906_s6] sm:$0xff]  ;;  %v141_v1 = vld [vmem:[%s906_s6 + $0x8] sm:$0xff]  ;;  %s963_s21 = scalar_lea.vmem [#allocation7], %s495_s28 }
  0x38   : > { %v142_v2 = vld [vmem:[%s906_s6 + $0x10] sm:$0xff]  ;;  %v143_v3 = vld [vmem:[%s906_s6 + $0x18] sm:$0xff]  ;;  %v144_v4 = vld [vmem:[%s906_s6 + $0x20] sm:$0xff]  ;;  %s506_s4 = sshll.u32 %s824_s0, 12  ;;  %s414_s5 = sshll.u32 %s963_s21, 4  ;;  %s1018_s5 = int_to_ptr.vmem [resolvable:$true] %s414_s5 }
  0x39   : > { %v145_v5 = vld [vmem:[%s906_s6 + $0x28] sm:$0xff]  ;;  %v146_v7 = vld [vmem:[%s906_s6 + $0x30] sm:$0xff]  ;;  %v147_v12 = vld [vmem:[%s906_s6 + $0x38] sm:$0xff]  ;;  %s1016_s9 = scalar_lea.hbm %s1066_s2, %s506_s4  ;;  %s400_s0 = scalar_lea.sflag [#allocation6], %s900_s27 }
  0x3a   : > { %v148_v15 = vld [vmem:[%s906_s6 + $0x40] sm:$0xff]  ;;  %v149_v16 = vld [vmem:[%s906_s6 + $0x48] sm:$0xff]  ;;  %v150_v23 = vld [vmem:[%s906_s6 + $0x50] sm:$0xff]  ;;  %s713_s10 = scalar_lea.vmem %s1018_s5, 4096  ;;  %p1075_p12 = scmp.ne.s32.totalorder %s1071_s22, 0 }
  0x3b   : > { %v151_v26 = vld [vmem:[%s906_s6 + $0x58] sm:$0xff]  ;;  %v152_v29 = vld [vmem:[%s906_s6 + $0x60] sm:$0xff]  ;;  %v153_v32 = vld [vmem:[%s906_s6 + $0x68] sm:$0xff]  ;;  %p714_p11 = scmp.ne.s32.totalorder %s1018_s5, %s713_s10  ;;  %s782_s15 = smov [#allocation7]  }
  0x3c   : > { %v154_v35 = vld [vmem:[%s906_s6 + $0x70] sm:$0xff]  ;;  %v155_v38 = vld [vmem:[%s906_s6 + $0x78] sm:$0xff]  ;;  %s717_s17 = sshll.u32 %s782_s15, 4  ;;  %s718_s17 = int_to_ptr.vmem [resolvable:$false] %s717_s17 }
  0x3d   : > { %s173_s3 = ssub.f32 0.0, %s172_s29  ;;  %p715_p13 = pnand %p714_p11, %p1075_p12 }
  0x3e   : > { %s719_s18 = scalar_lea.vmem %s718_s17, 8192  ;;  %p720_p5 = scmp.lt.s32.totalorder %s1018_s5, %s718_s17 }
  0x3f   : > { %v918_v6 = vstv %s173_s3  ;;  %p716_p4 = pneg %p715_p13  ;;  %p721_p7 = scmp.lt.s32.totalorder %s719_s18, %s713_s10 }
  0x40   : > { %v175_v8 = vmul.f32 %v918_v6, %v140_v0  ;;  %v176_v9 = vmul.f32 %v918_v6, %v141_v1  ;;  %v177_v10 = vmul.f32 %v918_v6, %v142_v2  ;;  %v178_v11 = vmul.f32 %v918_v6, %v143_v3  ;;  %v156_v2 = vld [vmem:[%s906_s6 + $0x80] sm:$0xff] }
  0x41   : > { %v179_v13 = vmul.f32 %v918_v6, %v144_v4  ;;  %v180_v14 = vmul.f32 %v918_v6, %v145_v5  ;;  %v181_v20 = vmul.f32 %v918_v6, %v146_v7  ;;  %v182_v22 = vmul.f32 %v918_v6, %v147_v12  ;;  %v157_v5 = vld [vmem:[%s906_s6 + $0x88] sm:$0xff]  ;;  %p722_p8 = por %p721_p7, %p720_p5 }
  0x42   : > { %v207_v17 = vmul.f32 1.442695, %v175_v8  ;;  %v209_v18 = vmul.f32 1.442695, %v176_v9  ;;  %v211_v19 = vmul.f32 1.442695, %v177_v10  ;;  %v183_v25 = vmul.f32 %v918_v6, %v148_v15 }
  0x43   : > { %v213_v21 = vmul.f32 1.442695, %v178_v11  ;;  %v215_v24 = vmul.f32 1.442695, %v179_v13  ;;  %v217_v27 = vmul.f32 1.442695, %v180_v14  ;;  %v184_v28 = vmul.f32 %v918_v6, %v149_v16  ;;  %p723_p10 = pnand %p722_p8, %p716_p4 }
  0x44   : > { %557 = vpow2.f32 %v207_v17  ;;  %v219_v30 = vmul.f32 1.442695, %v181_v20  ;;  %v185_v31 = vmul.f32 %v918_v6, %v150_v23  ;;  %v221_v33 = vmul.f32 1.442695, %v182_v22  ;;  %v158_v9 = vld [vmem:[%s906_s6 + $0x90] sm:$0xff]  ;;  %v159_v13 = vld [vmem:[%s906_s6 + $0x98] sm:$0xff] }
  0x45   : > { %559 = vpow2.f32 %v209_v18  ;;  %v186_v34 = vmul.f32 %v918_v6, %v151_v26  ;;  %v223_v36 = vmul.f32 1.442695, %v183_v25  ;;  %v187_v37 = vmul.f32 %v918_v6, %v152_v29  ;;  %v160_v17 = vld [vmem:[%s906_s6 + $0xa0] sm:$0xff]  ;;  %v162_v25 = vld [vmem:[%s906_s6 + $0xb0] sm:$0xff] }
  0x46   : > { %561 = vpow2.f32 %v211_v19  ;;  %v225_v39 = vmul.f32 1.442695, %v184_v28  ;;  %v188_v40 = vmul.f32 %v918_v6, %v153_v32  ;;  %v227_v41 = vmul.f32 1.442695, %v185_v31 }
  0x47   : > { %563 = vpow2.f32 %v213_v21  ;;  %v189_v42 = vmul.f32 %v918_v6, %v154_v35  ;;  %v229_v43 = vmul.f32 1.442695, %v186_v34  ;;  %v190_v44 = vmul.f32 %v918_v6, %v155_v38  ;;  %v161_v21 = vld [vmem:[%s906_s6 + $0xa8] sm:$0xff]  ;;  %v164_v35 = vld [vmem:[%s906_s6 + $0xc0] sm:$0xff] }
  0x48   : > { %565 = vpow2.f32 %v215_v24  ;;  %v231_v45 = vmul.f32 1.442695, %v187_v37  ;;  %v233_v46 = vmul.f32 1.442695, %v188_v40  ;;  %v191_v12 = vmul.f32 %v918_v6, %v156_v2 }
  0x49   : > { %567 = vpow2.f32 %v217_v27  ;;  %v235_v47 = vmul.f32 1.442695, %v189_v42  ;;  %v237_v48 = vmul.f32 1.442695, %v190_v44  ;;  %v192_v16 = vmul.f32 %v918_v6, %v157_v5 }
  0x4a   : > { %569 = vpow2.f32 %v219_v30  ;;  %v193_v20 = vmul.f32 %v918_v6, %v158_v9  ;;  %v194_v24 = vmul.f32 %v918_v6, %v159_v13  ;;  %v239_v28 = vmul.f32 1.442695, %v191_v12  ;;  %v163_v30 = vld [vmem:[%s906_s6 + $0xb8] sm:$0xff] }
  0x4b   : > { %571 = vpow2.f32 %v221_v33  ;;  %v195_v29 = vmul.f32 %v918_v6, %v160_v17  ;;  %v241_v33 = vmul.f32 1.442695, %v192_v16  ;;  %v196_v34 = vmul.f32 %v918_v6, %v161_v21 }
  0x4c   : > { %573 = vpow2.f32 %v223_v36  ;;  %v243_v37 = vmul.f32 1.442695, %v193_v20  ;;  %v197_v38 = vmul.f32 %v918_v6, %v162_v25  ;;  %v198_v42 = vmul.f32 %v918_v6, %v163_v30 }
  0x4d   : > { %575 = vpow2.f32 %v225_v39  ;;  %v165_v39 = vld [vmem:[%s906_s6 + $0xc8] sm:$0xff] }
  0x4e   : > { %577 = vpow2.f32 %v227_v41  ;;  %v245_v41 = vmul.f32 1.442695, %v194_v24 }
  0x4f   : > { %579 = vpow2.f32 %v229_v43  ;;  %v166_v43 = vld [vmem:[%s906_s6 + $0xd0] sm:$0xff] }
  0x50   : > { %581 = vpow2.f32 %v231_v45  ;;  %v247_v45 = vmul.f32 1.442695, %v195_v29 }
  0x51   : > { %v558_v49 = vpop.eup %557  ;;  %583 = vpow2.f32 %v233_v46  ;;  %v199_v46 = vmul.f32 %v918_v6, %v164_v35 }
  0x52   : > { %v560_v50 = vpop.eup %559  ;;  %v271_v51 = vadd.f32 1.0, %v558_v49  ;;  %585 = vpow2.f32 %v235_v47  ;;  %v167_v47 = vld [vmem:[%s906_s6 + $0xd8] sm:$0xff]  ;;  %v249_v49 = vmul.f32 1.442695, %v196_v34 }
  0x53   : > { %v562_v52 = vpop.eup %561  ;;  %v272_v53 = vadd.f32 1.0, %v560_v50  ;;  %587 = vpow2.f32 %v237_v48  ;;  %v200_v50 = vmul.f32 %v918_v6, %v165_v39 }
  0x54   : > { %v564_v54 = vpop.eup %563  ;;  %589 = vrcp.f32 %v271_v51  ;;  %v273_v55 = vadd.f32 1.0, %v562_v52  ;;  %v168_v51 = vld [vmem:[%s906_s6 + $0xe0] sm:$0xff] }
  0x55   : > { %v566_v56 = vpop.eup %565  ;;  %591 = vrcp.f32 %v272_v53  ;;  %v274_v57 = vadd.f32 1.0, %v564_v54  ;;  %v251_v53 = vmul.f32 1.442695, %v197_v38  ;;  %v201_v54 = vmul.f32 %v918_v6, %v166_v43 }
  0x56   : > { %v568_v58 = vpop.eup %567  ;;  %593 = vrcp.f32 %v273_v55  ;;  %v275_v59 = vadd.f32 1.0, %v566_v56  ;;  %v169_v55 = vld [vmem:[%s906_s6 + $0xe8] sm:$0xff] }
  0x57   : > { %v570_v60 = vpop.eup %569  ;;  %595 = vrcp.f32 %v274_v57  ;;  %v276_v61 = vadd.f32 1.0, %v568_v58  ;;  %v253_v57 = vmul.f32 1.442695, %v198_v42  ;;  %v202_v58 = vmul.f32 %v918_v6, %v167_v47 }
  0x58   : > { %v572_v62 = vpop.eup %571  ;;  %597 = vrcp.f32 %v275_v59  ;;  %v277_v63 = vadd.f32 1.0, %v570_v60  ;;  %v170_v59 = vld [vmem:[%s906_s6 + $0xf0] sm:$0xff]  ;;  %v204_v2 = vmul.f32 %v918_v6, %v169_v55 }
  0x59   : > { %v574_v0 = vpop.eup %573  ;;  %599 = vrcp.f32 %v276_v61  ;;  %v278_v1 = vadd.f32 1.0, %v572_v62  ;;  %v255_v61 = vmul.f32 1.442695, %v199_v46  ;;  %v203_v62 = vmul.f32 %v918_v6, %v168_v51 }
  0x5a   : > { %v576_v3 = vpop.eup %575  ;;  %601 = vrcp.f32 %v277_v63  ;;  %v279_v4 = vadd.f32 1.0, %v574_v0  ;;  %v171_v63 = vld [vmem:[%s906_s6 + $0xf8] sm:$0xff]  ;;  %v205_v5 = vmul.f32 %v918_v6, %v170_v59  ;;  %v265_v13 = vmul.f32 1.442695, %v204_v2 }
  0x5b   : > { %v578_v7 = vpop.eup %577  ;;  %603 = vrcp.f32 %v278_v1  ;;  %v280_v8 = vadd.f32 1.0, %v576_v3  ;;  %v257_v1 = vmul.f32 1.442695, %v200_v50  ;;  %v206_v9 = vmul.f32 %v918_v6, %v171_v63 }
  0x5c   : > { %v580_v10 = vpop.eup %579  ;;  %605 = vrcp.f32 %v279_v4  ;;  %v281_v11 = vadd.f32 1.0, %v578_v7  ;;  %v259_v4 = vmul.f32 1.442695, %v201_v54 }
  0x5d   : > { %v582_v14 = vpop.eup %581  ;;  %607 = vrcp.f32 %v280_v8  ;;  %v282_v15 = vadd.f32 1.0, %v580_v10  ;;  %v261_v8 = vmul.f32 1.442695, %v202_v58  ;;  %v269_v17 = vmul.f32 1.442695, %v206_v9 }
  0x5e   : > { %v584_v18 = vpop.eup %583  ;;  %609 = vrcp.f32 %v281_v11  ;;  %v283_v19 = vadd.f32 1.0, %v582_v14  ;;  %v263_v11 = vmul.f32 1.442695, %v203_v62 }
  0x5f   : > { %v586_v22 = vpop.eup %585  ;;  %611 = vrcp.f32 %v282_v15  ;;  %v284_v23 = vadd.f32 1.0, %v584_v18  ;;  %v267_v15 = vmul.f32 1.442695, %v205_v5 }
  0x60   : > { %v588_v26 = vpop.eup %587  ;;  %613 = vrcp.f32 %v283_v19  ;;  %v285_v27 = vadd.f32 1.0, %v586_v22 }
  0x61   : > { %v590_v31 = vpop.eup %589  ;;  %615 = vrcp.f32 %v284_v23  ;;  %v286_v32 = vadd.f32 1.0, %v588_v26 }
  0x62   : > { %v592_v36 = vpop.eup %591  ;;  %367 = vst [vmem:[%s963_s21] sm:$0xff] %v590_v31  ;;  %617 = vrcp.f32 %v285_v27 }
  0x63   : > { %v594_v40 = vpop.eup %593  ;;  %368 = vst [vmem:[%s963_s21 + $0x8] sm:$0xff] %v592_v36  ;;  %619 = vrcp.f32 %v286_v32 }
  0x64   : > { %v596_v44 = vpop.eup %595  ;;  %369 = vst [vmem:[%s963_s21 + $0x10] sm:$0xff] %v594_v40  ;;  %621 = vpow2.f32 %v239_v28 }
  0x65   : > { %v598_v48 = vpop.eup %597  ;;  %370 = vst [vmem:[%s963_s21 + $0x18] sm:$0xff] %v596_v44  ;;  %623 = vpow2.f32 %v241_v33 }
  0x66   : > { %v600_v52 = vpop.eup %599  ;;  %371 = vst [vmem:[%s963_s21 + $0x20] sm:$0xff] %v598_v48  ;;  %625 = vpow2.f32 %v243_v37 }
  0x67   : > { %v602_v56 = vpop.eup %601  ;;  %372 = vst [vmem:[%s963_s21 + $0x28] sm:$0xff] %v600_v52  ;;  %627 = vpow2.f32 %v245_v41 }
  0x68   : > { %v604_v60 = vpop.eup %603  ;;  %373 = vst [vmem:[%s963_s21 + $0x30] sm:$0xff] %v602_v56  ;;  %629 = vpow2.f32 %v247_v45 }
  0x69   : > { %v606_v0 = vpop.eup %605  ;;  %374 = vst [vmem:[%s963_s21 + $0x38] sm:$0xff] %v604_v60  ;;  %631 = vpow2.f32 %v249_v49 }
  0x6a   : > { %v608_v3 = vpop.eup %607  ;;  %375 = vst [vmem:[%s963_s21 + $0x40] sm:$0xff] %v606_v0  ;;  %633 = vpow2.f32 %v251_v53 }
  0x6b   : > { %v610_v7 = vpop.eup %609  ;;  %376 = vst [vmem:[%s963_s21 + $0x48] sm:$0xff] %v608_v3  ;;  %635 = vpow2.f32 %v253_v57 }
  0x6c   : > { %v612_v10 = vpop.eup %611  ;;  %377 = vst [vmem:[%s963_s21 + $0x50] sm:$0xff] %v610_v7  ;;  %637 = vpow2.f32 %v255_v61 }
  0x6d   : > { %v614_v12 = vpop.eup %613  ;;  %378 = vst [vmem:[%s963_s21 + $0x58] sm:$0xff] %v612_v10  ;;  %639 = vpow2.f32 %v257_v1 }
  0x6e   : > { %v616_v14 = vpop.eup %615  ;;  %379 = vst [vmem:[%s963_s21 + $0x60] sm:$0xff] %v614_v12  ;;  %641 = vpow2.f32 %v259_v4 }
  0x6f   : > { %v618_v16 = vpop.eup %617  ;;  %380 = vst [vmem:[%s963_s21 + $0x68] sm:$0xff] %v616_v14  ;;  %643 = vpow2.f32 %v261_v8 }
  0x70   : > { %v620_v18 = vpop.eup %619  ;;  %381 = vst [vmem:[%s963_s21 + $0x70] sm:$0xff] %v618_v16  ;;  %645 = vpow2.f32 %v263_v11 }
  0x71   : > { %v622_v6 = vpop.eup %621  ;;  %382 = vst [vmem:[%s963_s21 + $0x78] sm:$0xff] %v620_v18  ;;  %647 = vpow2.f32 %v265_v13 }
  0x72   : > { %v624_v19 = vpop.eup %623  ;;  %v287_v20 = vadd.f32 1.0, %v622_v6  ;;  %649 = vpow2.f32 %v267_v15 }
  0x73   : > { %v626_v21 = vpop.eup %625  ;;  %v288_v22 = vadd.f32 1.0, %v624_v19  ;;  %651 = vpow2.f32 %v269_v17 }
  0x74   : > { %v628_v23 = vpop.eup %627  ;;  %653 = vrcp.f32 %v287_v20  ;;  %v289_v24 = vadd.f32 1.0, %v626_v21 }
  0x75   : > { %v630_v25 = vpop.eup %629  ;;  %655 = vrcp.f32 %v288_v22  ;;  %v290_v26 = vadd.f32 1.0, %v628_v23 }
  0x76   : > { %v632_v27 = vpop.eup %631  ;;  %657 = vrcp.f32 %v289_v24  ;;  %v291_v28 = vadd.f32 1.0, %v630_v25 }
  0x77   : > { %v634_v29 = vpop.eup %633  ;;  %659 = vrcp.f32 %v290_v26  ;;  %v292_v30 = vadd.f32 1.0, %v632_v27 }
  0x78   : > { %v636_v31 = vpop.eup %635  ;;  %661 = vrcp.f32 %v291_v28  ;;  %v293_v32 = vadd.f32 1.0, %v634_v29 }
  0x79   : > { %v638_v33 = vpop.eup %637  ;;  %663 = vrcp.f32 %v292_v30  ;;  %v294_v34 = vadd.f32 1.0, %v636_v31 }
  0x7a   : > { %v640_v35 = vpop.eup %639  ;;  %665 = vrcp.f32 %v293_v32  ;;  %v295_v36 = vadd.f32 1.0, %v638_v33 }
  0x7b   : > { %v642_v37 = vpop.eup %641  ;;  %667 = vrcp.f32 %v294_v34  ;;  %v296_v38 = vadd.f32 1.0, %v640_v35 }
  0x7c   : > { %v644_v39 = vpop.eup %643  ;;  %669 = vrcp.f32 %v295_v36  ;;  %v297_v40 = vadd.f32 1.0, %v642_v37 }
  0x7d   : > { %v646_v41 = vpop.eup %645  ;;  %671 = vrcp.f32 %v296_v38  ;;  %v298_v42 = vadd.f32 1.0, %v644_v39 }
  0x7e   : > { %v648_v43 = vpop.eup %647  ;;  %673 = vrcp.f32 %v297_v40  ;;  %v299_v44 = vadd.f32 1.0, %v646_v41 }
  0x7f   : > { %v650_v45 = vpop.eup %649  ;;  %675 = vrcp.f32 %v298_v42  ;;  %v300_v46 = vadd.f32 1.0, %v648_v43 }
  0x80   : > { %v652_v47 = vpop.eup %651  ;;  %677 = vrcp.f32 %v299_v44  ;;  %v301_v48 = vadd.f32 1.0, %v650_v45 }
  0x81   : > { %v654_v49 = vpop.eup %653  ;;  %679 = vrcp.f32 %v300_v46  ;;  %v302_v50 = vadd.f32 1.0, %v652_v47 }
  0x82   : > { %v656_v51 = vpop.eup %655  ;;  %383 = vst [vmem:[%s963_s21 + $0x80] sm:$0xff] %v654_v49  ;;  %681 = vrcp.f32 %v301_v48 }
  0x83   : > { %v658_v52 = vpop.eup %657  ;;  %384 = vst [vmem:[%s963_s21 + $0x88] sm:$0xff] %v656_v51  ;;  %683 = vrcp.f32 %v302_v50 }
  0x84   : > { %v660_v53 = vpop.eup %659  ;;  %385 = vst [vmem:[%s963_s21 + $0x90] sm:$0xff] %v658_v52 }
  0x85   : > { %v662_v54 = vpop.eup %661  ;;  %386 = vst [vmem:[%s963_s21 + $0x98] sm:$0xff] %v660_v53 }
  0x86   : > { %v664_v55 = vpop.eup %663  ;;  %387 = vst [vmem:[%s963_s21 + $0xa0] sm:$0xff] %v662_v54 }
  0x87   : > { %v666_v56 = vpop.eup %665  ;;  %388 = vst [vmem:[%s963_s21 + $0xa8] sm:$0xff] %v664_v55 }
  0x88   : > { %v668_v57 = vpop.eup %667  ;;  %389 = vst [vmem:[%s963_s21 + $0xb0] sm:$0xff] %v666_v56 }
  0x89   : > { %v670_v58 = vpop.eup %669  ;;  %390 = vst [vmem:[%s963_s21 + $0xb8] sm:$0xff] %v668_v57 }
  0x8a   : > { %v672_v59 = vpop.eup %671  ;;  %391 = vst [vmem:[%s963_s21 + $0xc0] sm:$0xff] %v670_v58 }
  0x8b   : > { %v674_v60 = vpop.eup %673  ;;  %392 = vst [vmem:[%s963_s21 + $0xc8] sm:$0xff] %v672_v59 }
  0x8c   : > { %v676_v61 = vpop.eup %675  ;;  %393 = vst [vmem:[%s963_s21 + $0xd0] sm:$0xff] %v674_v60 }
  0x8d   : > { %v678_v62 = vpop.eup %677  ;;  %394 = vst [vmem:[%s963_s21 + $0xd8] sm:$0xff] %v676_v61 }
  0x8e   : > { %v680_v63 = vpop.eup %679  ;;  %395 = vst [vmem:[%s963_s21 + $0xe0] sm:$0xff] %v678_v62 }
  0x8f   : > { %v682_v0 = vpop.eup %681  ;;  %396 = vst [vmem:[%s963_s21 + $0xe8] sm:$0xff] %v680_v63 }
  0x90   : > { %v684_v1 = vpop.eup %683  ;;  %397 = vst [vmem:[%s963_s21 + $0xf0] sm:$0xff] %v682_v0 }
  0x91   : > { %398 = vst [vmem:[%s963_s21 + $0xf8] sm:$0xff] %v684_v1 }
  0x92   : > { %726 = shalt.err (!%p723_p10)
}
  0x93   : > { %s727_s20 = scalar_lea.hbm %s1016_s9, 4096  ;;  %s731_s26 = scalar_lea.hbm %s1066_s2, 8192 }
  0x94   : > { %p728_p0 = scmp.ne.s32.totalorder %s1016_s9, %s727_s20  ;;  %p732_p1 = scmp.lt.s32.totalorder %s1016_s9, %s1066_s2 }
  0x95   : > { %p733_p3 = scmp.lt.s32.totalorder %s731_s26, %s727_s20 }
  0x96   : > { %p729_p2 = pnand %p728_p0, %p1075_p12 }
  0x97   : > { %p734_p6 = por %p733_p3, %p732_p1 }
  0x98   : > { %p730_p9 = pneg %p729_p2 }
  0x9a   : > { %p735_p11 = pnand %p734_p6, %p730_p9 }
  0x9c   : > { %738 = shalt.err (!%p735_p11)
}
  0x9d   : > { %s783_s6 = smov 1024   ;;  %s784_s29 = smov 64  }
  0x9e   : > { %509 = dma.vmem_to_hbm [thread:$0]  (%p1075_p12), %s1018_s5, 4096, %s1016_s9, %s400_s0, %s783_s6, %s783_s6, %s784_s29  }
  0x9f PF: > { %s429_s3 = sand.u32 1, %s765_s11   ;;  %p1076_p13 = scmp.ne.s32.totalorder %s1072_s23, 0 }
  0xa0   : > { %p1077_p4 = scmp.ge.s32.totalorder %s777_s14, 2  ;;  %s430_s21 = scalar_lea.sflag [#allocation6], %s429_s3 }
  0xa2   : > { %p516_p5 = pnand %p1077_p4, %p1076_p13 }
  0xa4   : > { %p517_p7 = pneg %p516_p5 }
  0xa6   : > { %760 = dma.done.wait (%p517_p7), %s430_s21, 4096  }
  0xa7   : > { %762 = vsyncadd (%p517_p7), %s430_s21, 4294963200  ;;  %p16_p8 = scmp.ge.s32.totalorder %s828_s16, 4   ;;  %s1078_s11 = smov %s769_s12 }
  0xa8   : > { %s1079_s12 = smov %s773_s13  ;;  %s1080_s13 = smov %s840_s19 }
  0xa9   : > { %s1081_s14 = smov %s828_s16  ;;  %18 = sbr.rel (!%p16_p8) target bundleno = 7 (0x7), region = 69 }
  0xae   :  { %435 = vsyncpa [#allocation5], 1 }
  0xaf   :  { %437 = vsyncpa [#allocation5 + $0x1], 1 }
  0xb0   :  { %438 = vsyncpa [#allocation6], 1 }
  0xb1   :  { %440 = vsyncpa [#allocation6 + $0x1], 1 }

</bundles_post_ra>
